<compile_context>
chip_gen: v5e
topology: v5e:2x2
jax: 0.10.0
libtpu: 0.0.40
codegen_flags: <defaults>
</compile_context>

<pallas_src>
import jax
import jax.numpy as jnp
from jax.experimental import pallas as pl
from jax.experimental.pallas import tpu as pltpu

LANES = 128
MAX_BLOCK_ROWS = 1024  # (1024, 128) f32 = 512 KiB per input per pipeline buffer


def _combined_sums_kernel(n_ref, x_ref, m_ref, sums_ref,
                          acc_inter, acc_total, acc_bpos, acc_bneg):
    """Accumulate the four global sums needed by CombinedLoss2."""
    i = pl.program_id(0)

    @pl.when(i == 0)
    def _init():
        acc_inter[...] = jnp.zeros_like(acc_inter)
        acc_total[...] = jnp.zeros_like(acc_total)
        acc_bpos[...] = jnp.zeros_like(acc_bpos)
        acc_bneg[...] = jnp.zeros_like(acc_bneg)

    x = x_ref[...].astype(jnp.float32)
    m = m_ref[...].astype(jnp.float32)

    # Validity mask for the ragged tail tile: global flat element index < n.
    block_rows = x_ref.shape[0]
    rows = jax.lax.broadcasted_iota(jnp.int32, x.shape, 0) + i * block_rows
    cols = jax.lax.broadcasted_iota(jnp.int32, x.shape, 1)
    valid = (rows * LANES + cols) < n_ref[0]

    sig = jax.nn.sigmoid(x)                                           # EUP
    # softplus(-x) = -log(sigmoid(x)), stable form; softplus(x) = softplus(-x) + x
    sp_neg = jnp.maximum(-x, 0.0) + jnp.log1p(jnp.exp(-jnp.abs(x)))   # EUP
    sp_pos = sp_neg + x

    zero = jnp.zeros_like(x)
    inter = jnp.where(valid, sig * m, zero)          # sum -> intersection
    total = jnp.where(valid, sig + m, zero)          # sum -> total_overlap
    bpos = jnp.where(valid, m * sp_neg, zero)        # sum -> BCE positive term (x pos_weight)
    bneg = jnp.where(valid, (1.0 - m) * sp_pos, zero)  # sum -> BCE negative term

    # Sublane-axis reduction only; accumulate as 128-lane vectors in VMEM.
    acc_inter[...] += jnp.sum(inter, axis=0, keepdims=True)
    acc_total[...] += jnp.sum(total, axis=0, keepdims=True)
    acc_bpos[...] += jnp.sum(bpos, axis=0, keepdims=True)
    acc_bneg[...] += jnp.sum(bneg, axis=0, keepdims=True)

    @pl.when(i == pl.num_programs(0) - 1)
    def _finalize():
        sums_ref[0] = jnp.sum(acc_inter[...])
        sums_ref[1] = jnp.sum(acc_total[...])
        sums_ref[2] = jnp.sum(acc_bpos[...])
        sums_ref[3] = jnp.sum(acc_bneg[...])


def combined_loss2(outputs, masks, pos_weight, smooth=1.0):
    """Pallas implementation of CombinedLoss2(pos_weight).forward(outputs, masks, smooth)."""
    n = outputs.size
    o = outputs.reshape(-1)
    m = masks.reshape(-1)

    # Only a sub-128-element pad if numel isn't lane aligned (padded elements are
    # masked out in-kernel via the true count, so pad values are irrelevant).
    rem = n % LANES
    if rem:
        pad = LANES - rem
        o = jnp.pad(o, (0, pad))
        m = jnp.pad(m, (0, pad))

    rows = o.shape[0] // LANES
    o2 = o.reshape(rows, LANES)
    m2 = m.reshape(rows, LANES)

    if rows <= MAX_BLOCK_ROWS:
        block_rows = rows           # full-array block (allowed even if not %8)
        grid = (1,)
    else:
        block_rows = MAX_BLOCK_ROWS
        grid = (pl.cdiv(rows, MAX_BLOCK_ROWS),)  # ragged tail masked in-kernel

    n_arr = jnp.array([n], dtype=jnp.int32)

    sums = pl.pallas_call(
        _combined_sums_kernel,
        out_shape=jax.ShapeDtypeStruct((4,), jnp.float32),
        grid_spec=pltpu.PrefetchScalarGridSpec(
            num_scalar_prefetch=1,
            grid=grid,
            in_specs=[
                pl.BlockSpec((block_rows, LANES), lambda i, n_ref: (i, 0)),
                pl.BlockSpec((block_rows, LANES), lambda i, n_ref: (i, 0)),
            ],
            out_specs=pl.BlockSpec(memory_space=pltpu.SMEM),
            scratch_shapes=[
                pltpu.VMEM((1, LANES), jnp.float32),
                pltpu.VMEM((1, LANES), jnp.float32),
                pltpu.VMEM((1, LANES), jnp.float32),
                pltpu.VMEM((1, LANES), jnp.float32),
            ],
        ),
        # TODO(synk): on v7x, add a leading "parallel" grid axis of size 2 with
        # per-core partial sums to use both TensorCores.
        compiler_params=pltpu.CompilerParams(
            dimension_semantics=("arbitrary",),  # sequential accumulation axis
        ),
    )(n_arr, o2, m2)

    intersection = sums[0]
    total_overlap = sums[1]
    bce = (pos_weight * sums[2] + sums[3]) / n

    union = total_overlap - intersection
    iou = (intersection + smooth) / (union + smooth)
    modified_dice = 2.0 * iou / (iou + 1.0)
    return bce - jnp.log(modified_dice)


def _combined_loss2_ref(outputs, masks, pos_weight, smooth=1.0):
    """Pure-JAX reference mirroring the PyTorch module."""
    x = outputs.astype(jnp.float32)
    m = masks.astype(jnp.float32)
    sig = jax.nn.sigmoid(x)
    intersection = jnp.sum(sig * m)
    total_overlap = jnp.sum(sig + m)
    union = total_overlap - intersection
    iou = (intersection + smooth) / (union + smooth)
    modified_dice = 2.0 * iou / (iou + 1.0)
    sp_pos = jnp.maximum(x, 0.0) + jnp.log1p(jnp.exp(-jnp.abs(x)))  # softplus(x)
    sp_neg = sp_pos - x                                             # softplus(-x)
    bce = jnp.mean(pos_weight * m * sp_neg + (1.0 - m) * sp_pos)
    return bce - jnp.log(modified_dice)


if __name__ == "__main__":
    key = jax.random.PRNGKey(0)
    k1, k2 = jax.random.split(key)

    # NCHW inputs with C == 1, matching the module's squeeze(1).
    N, C, H, W = 2, 1, 16, 16
    outputs = jax.random.normal(k1, (N, C, H, W), dtype=jnp.float32)          # logits
    masks = (jax.random.uniform(k2, (N, C, H, W)) > 0.5).astype(jnp.float32)  # binary masks
    pos_weight = 2.0

    loss = jax.block_until_ready(combined_loss2(outputs, masks, pos_weight, smooth=1.0))
    ref = jax.block_until_ready(_combined_loss2_ref(outputs, masks, pos_weight, smooth=1.0))

    assert jnp.allclose(loss, ref, rtol=1e-5, atol=1e-5), (loss, ref)
    print("KERNEL_OK")
</pallas_src>

<mosaic_0001>
module attributes {stable_mosaic.version = 11 : i64} {
  func.func @_combined_sums_kernel(%arg0: i32, %arg1: memref<1xi32, #tpu.memory_space<smem>>, %arg2: memref<4x128xf32, #tpu.memory_space<vmem>>, %arg3: memref<4x128xf32, #tpu.memory_space<vmem>>, %arg4: memref<4xf32, #tpu.memory_space<smem>>, %arg5: memref<1x128xf32, #tpu.memory_space<vmem>>, %arg6: memref<1x128xf32, #tpu.memory_space<vmem>>, %arg7: memref<1x128xf32, #tpu.memory_space<vmem>>, %arg8: memref<1x128xf32, #tpu.memory_space<vmem>>) attributes {dimension_semantics = [#tpu.dimension_semantics<arbitrary>], iteration_bounds = array<i64: 1>, scalar_prefetch = 1 : i64, scratch_operands = 4 : i64, tpu.core_type = #tpu.core_type<tc>, window_params = [{transform_indices = @transform_0, window_bounds = array<i64: 4, 128>}, {transform_indices = @transform_1, window_bounds = array<i64: 4, 128>}, {transform_indices = @transform_2, window_bounds = array<i64: 4>}]} {
    %c0_i32 = arith.constant 0 : i32
    %0 = arith.cmpi eq, %arg0, %c0_i32 : i32
    %1 = arith.extui %0 : i1 to i32
    %c0_i32_0 = arith.constant 0 : i32
    %2 = arith.cmpi ne, %1, %c0_i32_0 : i32
    scf.if %2 {
      %cst_32 = arith.constant 0.000000e+00 : f32
      %66 = vector.broadcast %cst_32 : f32 to vector<1x128xf32>
      %c0_33 = arith.constant 0 : index
      %c0_34 = arith.constant 0 : index
      %67 = vector.load %arg5[%c0_33, %c0_34] : memref<1x128xf32, #tpu.memory_space<vmem>>, vector<1x128xf32>
      tpu.vector_store %arg5[%c0_33, %c0_34], %66 {strides = array<i32>} : memref<1x128xf32, #tpu.memory_space<vmem>>, vector<1x128xf32>,
      %cst_35 = arith.constant 0.000000e+00 : f32
      %68 = vector.broadcast %cst_35 : f32 to vector<1x128xf32>
      %c0_36 = arith.constant 0 : index
      %c0_37 = arith.constant 0 : index
      %69 = vector.load %arg6[%c0_36, %c0_37] : memref<1x128xf32, #tpu.memory_space<vmem>>, vector<1x128xf32>
      tpu.vector_store %arg6[%c0_36, %c0_37], %68 {strides = array<i32>} : memref<1x128xf32, #tpu.memory_space<vmem>>, vector<1x128xf32>,
      %cst_38 = arith.constant 0.000000e+00 : f32
      %70 = vector.broadcast %cst_38 : f32 to vector<1x128xf32>
      %c0_39 = arith.constant 0 : index
      %c0_40 = arith.constant 0 : index
      %71 = vector.load %arg7[%c0_39, %c0_40] : memref<1x128xf32, #tpu.memory_space<vmem>>, vector<1x128xf32>
      tpu.vector_store %arg7[%c0_39, %c0_40], %70 {strides = array<i32>} : memref<1x128xf32, #tpu.memory_space<vmem>>, vector<1x128xf32>,
      %cst_41 = arith.constant 0.000000e+00 : f32
      %72 = vector.broadcast %cst_41 : f32 to vector<1x128xf32>
      %c0_42 = arith.constant 0 : index
      %c0_43 = arith.constant 0 : index
      %73 = vector.load %arg8[%c0_42, %c0_43] : memref<1x128xf32, #tpu.memory_space<vmem>>, vector<1x128xf32>
      tpu.vector_store %arg8[%c0_42, %c0_43], %72 {strides = array<i32>} : memref<1x128xf32, #tpu.memory_space<vmem>>, vector<1x128xf32>,
    } else {
    }
    %c0 = arith.constant 0 : index
    %c0_1 = arith.constant 0 : index
    %3 = vector.load %arg2[%c0, %c0_1] : memref<4x128xf32, #tpu.memory_space<vmem>>, vector<4x128xf32>
    %c0_2 = arith.constant 0 : index
    %c0_3 = arith.constant 0 : index
    %4 = vector.load %arg3[%c0_2, %c0_3] : memref<4x128xf32, #tpu.memory_space<vmem>>, vector<4x128xf32>
    %5 = tpu.iota {dimensions = array<i32: 0>} : vector<4x128xi32>
    %c4_i32 = arith.constant 4 : i32
    %6 = arith.muli %arg0, %c4_i32 : i32
    %7 = vector.broadcast %6 : i32 to vector<4x128xi32>
    %8 = arith.addi %5, %7 : vector<4x128xi32>
    %9 = tpu.iota {dimensions = array<i32: 1>} : vector<4x128xi32>
    %c128_i32 = arith.constant 128 : i32
    %10 = vector.broadcast %c128_i32 : i32 to vector<4x128xi32>
    %11 = arith.muli %8, %10 : vector<4x128xi32>
    %12 = arith.addi %11, %9 : vector<4x128xi32>
    %c0_4 = arith.constant 0 : index
    %13 = memref.load %arg1[%c0_4] : memref<1xi32, #tpu.memory_space<smem>>
    %14 = vector.broadcast %13 : i32 to vector<4x128xi32>
    %15 = arith.cmpi slt, %12, %14 : vector<4x128xi32>
    %16 = arith.negf %3 : vector<4x128xf32>
    %17 = math.exp %16 : vector<4x128xf32>
    %cst = arith.constant 1.000000e+00 : f32
    %18 = vector.broadcast %cst : f32 to vector<4x128xf32>
    %19 = arith.addf %18, %17 : vector<4x128xf32>
    %20 = arith.divf %18, %19 : vector<4x128xf32>
    %cst_5 = arith.constant 0.000000e+00 : f32
    %21 = vector.broadcast %cst_5 : f32 to vector<4x128xf32>
    %22 = arith.subf %21, %3 : vector<4x128xf32>
    %cst_6 = arith.constant 0.000000e+00 : f32
    %23 = vector.broadcast %cst_6 : f32 to vector<4x128xf32>
    %24 = arith.maximumf %22, %23 : vector<4x128xf32>
    %25 = math.absf %3 : vector<4x128xf32>
    %cst_7 = arith.constant 0.000000e+00 : f32
    %26 = vector.broadcast %cst_7 : f32 to vector<4x128xf32>
    %27 = arith.subf %26, %25 : vector<4x128xf32>
    %28 = math.exp %27 : vector<4x128xf32>
    %29 = math.log1p %28 : vector<4x128xf32>
    %30 = arith.addf %24, %29 : vector<4x128xf32>
    %31 = arith.addf %30, %3 : vector<4x128xf32>
    %cst_8 = arith.constant 0.000000e+00 : f32
    %32 = vector.broadcast %cst_8 : f32 to vector<4x128xf32>
    %33 = arith.mulf %20, %4 : vector<4x128xf32>
    %34 = arith.select %15, %33, %32 : vector<4x128xi1>, vector<4x128xf32>
    %35 = arith.addf %20, %4 : vector<4x128xf32>
    %36 = arith.select %15, %35, %32 : vector<4x128xi1>, vector<4x128xf32>
    %37 = arith.mulf %4, %30 : vector<4x128xf32>
    %38 = arith.select %15, %37, %32 : vector<4x128xi1>, vector<4x128xf32>
    %cst_9 = arith.constant 1.000000e+00 : f32
    %39 = vector.broadcast %cst_9 : f32 to vector<4x128xf32>
    %40 = arith.subf %39, %4 : vector<4x128xf32>
    %41 = arith.mulf %40, %31 : vector<4x128xf32>
    %42 = arith.select %15, %41, %32 : vector<4x128xi1>, vector<4x128xf32>
    %c0_10 = arith.constant 0 : index
    %c0_11 = arith.constant 0 : index
    %43 = vector.load %arg5[%c0_10, %c0_11] : memref<1x128xf32, #tpu.memory_space<vmem>>, vector<1x128xf32>
    %cst_12 = arith.constant dense<0.000000e+00> : vector<128xf32>
    %44 = vector.multi_reduction <add>, %34, %cst_12 [0] : vector<4x128xf32> to vector<128xf32>
    %45 = vector.shape_cast %44 : vector<128xf32> to vector<1x128xf32>
    %46 = arith.addf %43, %45 : vector<1x128xf32>
    %c0_13 = arith.constant 0 : index
    %c0_14 = arith.constant 0 : index
    %47 = vector.load %arg5[%c0_13, %c0_14] : memref<1x128xf32, #tpu.memory_space<vmem>>, vector<1x128xf32>
    tpu.vector_store %arg5[%c0_13, %c0_14], %46 {strides = array<i32>} : memref<1x128xf32, #tpu.memory_space<vmem>>, vector<1x128xf32>,
    %c0_15 = arith.constant 0 : index
    %c0_16 = arith.constant 0 : index
    %48 = vector.load %arg6[%c0_15, %c0_16] : memref<1x128xf32, #tpu.memory_space<vmem>>, vector<1x128xf32>
    %cst_17 = arith.constant dense<0.000000e+00> : vector<128xf32>
    %49 = vector.multi_reduction <add>, %36, %cst_17 [0] : vector<4x128xf32> to vector<128xf32>
    %50 = vector.shape_cast %49 : vector<128xf32> to vector<1x128xf32>
    %51 = arith.addf %48, %50 : vector<1x128xf32>
    %c0_18 = arith.constant 0 : index
    %c0_19 = arith.constant 0 : index
    %52 = vector.load %arg6[%c0_18, %c0_19] : memref<1x128xf32, #tpu.memory_space<vmem>>, vector<1x128xf32>
    tpu.vector_store %arg6[%c0_18, %c0_19], %51 {strides = array<i32>} : memref<1x128xf32, #tpu.memory_space<vmem>>, vector<1x128xf32>,
    %c0_20 = arith.constant 0 : index
    %c0_21 = arith.constant 0 : index
    %53 = vector.load %arg7[%c0_20, %c0_21] : memref<1x128xf32, #tpu.memory_space<vmem>>, vector<1x128xf32>
    %cst_22 = arith.constant dense<0.000000e+00> : vector<128xf32>
    %54 = vector.multi_reduction <add>, %38, %cst_22 [0] : vector<4x128xf32> to vector<128xf32>
    %55 = vector.shape_cast %54 : vector<128xf32> to vector<1x128xf32>
    %56 = arith.addf %53, %55 : vector<1x128xf32>
    %c0_23 = arith.constant 0 : index
    %c0_24 = arith.constant 0 : index
    %57 = vector.load %arg7[%c0_23, %c0_24] : memref<1x128xf32, #tpu.memory_space<vmem>>, vector<1x128xf32>
    tpu.vector_store %arg7[%c0_23, %c0_24], %56 {strides = array<i32>} : memref<1x128xf32, #tpu.memory_space<vmem>>, vector<1x128xf32>,
    %c0_25 = arith.constant 0 : index
    %c0_26 = arith.constant 0 : index
    %58 = vector.load %arg8[%c0_25, %c0_26] : memref<1x128xf32, #tpu.memory_space<vmem>>, vector<1x128xf32>
    %cst_27 = arith.constant dense<0.000000e+00> : vector<128xf32>
    %59 = vector.multi_reduction <add>, %42, %cst_27 [0] : vector<4x128xf32> to vector<128xf32>
    %60 = vector.shape_cast %59 : vector<128xf32> to vector<1x128xf32>
    %61 = arith.addf %58, %60 : vector<1x128xf32>
    %c0_28 = arith.constant 0 : index
    %c0_29 = arith.constant 0 : index
    %62 = vector.load %arg8[%c0_28, %c0_29] : memref<1x128xf32, #tpu.memory_space<vmem>>, vector<1x128xf32>
    tpu.vector_store %arg8[%c0_28, %c0_29], %61 {strides = array<i32>} : memref<1x128xf32, #tpu.memory_space<vmem>>, vector<1x128xf32>,
    %c0_i32_30 = arith.constant 0 : i32
    %63 = arith.cmpi eq, %arg0, %c0_i32_30 : i32
    %64 = arith.extui %63 : i1 to i32
    %c0_i32_31 = arith.constant 0 : i32
    %65 = arith.cmpi ne, %64, %c0_i32_31 : i32
    scf.if %65 {
      %c0_32 = arith.constant 0 : index
      %c0_33 = arith.constant 0 : index
      %66 = vector.load %arg5[%c0_32, %c0_33] : memref<1x128xf32, #tpu.memory_space<vmem>>, vector<1x128xf32>
      %67 = vector.shape_cast %66 : vector<1x128xf32> to vector<1x1x128xf32>
      %cst_34 = arith.constant dense<0.000000e+00> : vector<1xf32>
      %68 = vector.multi_reduction <add>, %67, %cst_34 [1, 2] : vector<1x1x128xf32> to vector<1xf32>
      %69 = vector.shape_cast %68 : vector<1xf32> to vector<1x1x1xf32>
      %70 = vector.extract %69[0, 0, 0] : f32 from vector<1x1x1xf32>
      %c0_35 = arith.constant 0 : index
      %71 = memref.load %arg4[%c0_35] : memref<4xf32, #tpu.memory_space<smem>>
      memref.store %70, %arg4[%c0_35] : memref<4xf32, #tpu.memory_space<smem>>
      %c0_36 = arith.constant 0 : index
      %c0_37 = arith.constant 0 : index
      %72 = vector.load %arg6[%c0_36, %c0_37] : memref<1x128xf32, #tpu.memory_space<vmem>>, vector<1x128xf32>
      %73 = vector.shape_cast %72 : vector<1x128xf32> to vector<1x1x128xf32>
      %cst_38 = arith.constant dense<0.000000e+00> : vector<1xf32>
      %74 = vector.multi_reduction <add>, %73, %cst_38 [1, 2] : vector<1x1x128xf32> to vector<1xf32>
      %75 = vector.shape_cast %74 : vector<1xf32> to vector<1x1x1xf32>
      %76 = vector.extract %75[0, 0, 0] : f32 from vector<1x1x1xf32>
      %c1 = arith.constant 1 : index
      %77 = memref.load %arg4[%c1] : memref<4xf32, #tpu.memory_space<smem>>
      memref.store %76, %arg4[%c1] : memref<4xf32, #tpu.memory_space<smem>>
      %c0_39 = arith.constant 0 : index
      %c0_40 = arith.constant 0 : index
      %78 = vector.load %arg7[%c0_39, %c0_40] : memref<1x128xf32, #tpu.memory_space<vmem>>, vector<1x128xf32>
      %79 = vector.shape_cast %78 : vector<1x128xf32> to vector<1x1x128xf32>
      %cst_41 = arith.constant dense<0.000000e+00> : vector<1xf32>
      %80 = vector.multi_reduction <add>, %79, %cst_41 [1, 2] : vector<1x1x128xf32> to vector<1xf32>
      %81 = vector.shape_cast %80 : vector<1xf32> to vector<1x1x1xf32>
      %82 = vector.extract %81[0, 0, 0] : f32 from vector<1x1x1xf32>
      %c2 = arith.constant 2 : index
      %83 = memref.load %arg4[%c2] : memref<4xf32, #tpu.memory_space<smem>>
      memref.store %82, %arg4[%c2] : memref<4xf32, #tpu.memory_space<smem>>
      %c0_42 = arith.constant 0 : index
      %c0_43 = arith.constant 0 : index
      %84 = vector.load %arg8[%c0_42, %c0_43] : memref<1x128xf32, #tpu.memory_space<vmem>>, vector<1x128xf32>
      %85 = vector.shape_cast %84 : vector<1x128xf32> to vector<1x1x128xf32>
      %cst_44 = arith.constant dense<0.000000e+00> : vector<1xf32>
      %86 = vector.multi_reduction <add>, %85, %cst_44 [1, 2] : vector<1x1x128xf32> to vector<1xf32>
      %87 = vector.shape_cast %86 : vector<1xf32> to vector<1x1x1xf32>
      %88 = vector.extract %87[0, 0, 0] : f32 from vector<1x1x1xf32>
      %c3 = arith.constant 3 : index
      %89 = memref.load %arg4[%c3] : memref<4xf32, #tpu.memory_space<smem>>
      memref.store %88, %arg4[%c3] : memref<4xf32, #tpu.memory_space<smem>>
    } else {
    }
    return
  }
  func.func @transform_0(%arg0: i32, %arg1: memref<1xi32, #tpu.memory_space<smem>>) -> (i32, i32) {
    %c0_i32 = arith.constant 0 : i32
    %c0_i32_0 = arith.constant 0 : i32
    return %arg0, %c0_i32 : i32, i32
  }
  func.func @transform_1(%arg0: i32, %arg1: memref<1xi32, #tpu.memory_space<smem>>) -> (i32, i32) {
    %c0_i32 = arith.constant 0 : i32
    %c0_i32_0 = arith.constant 0 : i32
    return %arg0, %c0_i32 : i32, i32
  }
  func.func @transform_2(%arg0: i32, %arg1: memref<1xi32, #tpu.memory_space<smem>>) -> i32 {
    %c0_i32 = arith.constant 0 : i32
    %c0_i32_0 = arith.constant 0 : i32
    return %c0_i32 : i32
  }
}

</mosaic_0001>

<bundles_post_ra>
// kernel: tpu_custom_call.1
= control target key start
LH: loop header
LB: loop body
LE: loop exit
PB: predicated region body
PF: predicated region fallthrough
CT: control target
= control target key end

     0   :  { %9 = vsyncpa [#allocation9], 0  ;;  %s358_s0 = inlined_call_operand.<no memory space> [shape: s32[1], index: 0, kind: input, shape index: {}]   ;;  %s359_s1 = inlined_call_operand.hbm [shape: f32[4,128], index: 1, kind: input, shape index: {}]   ;;  %s360_s2 = inlined_call_operand.hbm [shape: f32[4,128], index: 2, kind: input, shape index: {}]   ;;  %s361_s3 = inlined_call_operand.hbm [shape: f32[4], index: 3, kind: output, shape index: {}]  }
   0x1   :  { %10 = vsyncpa [#allocation12], 0 }
   0x2   :  { %11 = vsyncpa [#allocation10], 0  ;;  %s17_s14 = sshll.u32 %s359_s1, 4  ;;  %s310_s15 = smov [#allocation8]   ;;  %s18_s14 = int_to_ptr.hbm [resolvable:$true] %s17_s14 }
   0x3   :  { %s19_s16 = sshll.u32 %s310_s15, 4  ;;  %s28_s19 = sshll.u32 %s360_s2, 4  ;;  %s20_s16 = int_to_ptr.vmem [resolvable:$true] %s19_s16  ;;  %s29_s19 = int_to_ptr.hbm [resolvable:$true] %s28_s19 }
   0x4   :  { %22 = dma.hbm_to_vmem [thread:$0]  %s18_s14, 64, %s20_s16, [#allocation9]  }
   0x5   :  { %s311_s20 = smov [#allocation11]  }
   0x6   :  { %s30_s21 = sshll.u32 %s311_s20, 4  ;;  %s31_s21 = int_to_ptr.vmem [resolvable:$true] %s30_s21 }
   0x7   :  { %33 = dma.hbm_to_vmem [thread:$0]  %s29_s19, 64, %s31_s21, [#allocation12]  }
   0x8   :  { %304 = dma.done.wait [#allocation9], 64  }
   0x9   :  { %305 = vsyncadd [#allocation9], 4294967232 }
   0xa   :  { %306 = dma.done.wait [#allocation12], 64  }
   0xb   :  { %307 = vsyncadd [#allocation12], 4294967232  ;;  %v312_v0 = vmov 0.0   ;;  %v50_v1 = vld [vmem:[#allocation8] sm:$0xf]  ;;  %v52_v8 = vlaneseq  ;;  %v62_v29 = vstv %s358_s0  ;;  %vm110_vm6 = vcmask 1043456  }
   0xc   :  { %48 = vst [vmem:[#allocation4] sm:$0x1] %v312_v0  ;;  %v223_v2 = vmul.f32 -1.442695, %v50_v1  ;;  %v85_v3 = vand.u32 2147483647, %v50_v1 }
   0xd   :  { %46 = vst [vmem:[#allocation2] sm:$0x1] %v312_v0  ;;  %v53_v12 = vshrl.u32 %v52_v8, 7  ;;  %v83_v15 = vsub.f32 0.0, %v50_v1  ;;  %v58_v17 = vand.u32 127, %v52_v8  ;;  %vm154_vm7 = vcmask 1040384  }
   0xe   :  { %47 = vst [vmem:[#allocation3] sm:$0x1] %v312_v0  ;;  %236 = vpow2.f32 %v223_v2  ;;  %v86_v4 = vsub.f32 0.0, %v85_v3  ;;  %v51_v31 = vld [vmem:[#allocation11] sm:$0xf]  ;;  %s211_s24 = sshll.u32 %s361_s3, 4  ;;  %s212_s24 = int_to_ptr.hbm [resolvable:$true] %s211_s24 }
   0xf   :  { %49 = vst [vmem:[#allocation5] sm:$0x1] %v312_v0  ;;  %v59_v18 = vmul.u32 128, %v53_v12  ;;  %v84_v25 = vmax.f32 %v83_v15, 0.0  ;;  %v106_v35 = vsub.f32 1.0, %v51_v31  ;;  %s313_s28 = smov [#allocation13]  }
  0x10   :  { %v87_v5 = vmul.f32 1.442695, %v86_v4 }
  0x11   :  { %v60_v26 = vadd.s32 %v59_v18, %v58_v17 }
  0x12   :  { %238 = vpow2.f32 %v87_v5 }
  0x13   :  { %vm343_vm5 = vcmp.lt.s32.totalorder %v60_v26, %v62_v29  ;;  %v130_v5 = vld [vmem:[#allocation4] sm:$0x1] }
  0x14   :  { %v237_v6 = vpop.eup %236 }
  0x15   :  { %v67_v7 = vadd.f32 1.0, %v237_v6 }
  0x17   :  { %240 = vrcp.f32 %v67_v7  ;;  %vm73_vm0 = vweird.f32 %v67_v7  ;;  %v79_v20 = vand.u32 2147483648, %v67_v7  ;;  %v77_v23 = vand.u32 2147483647, %v67_v7 }
  0x18   :  { %v239_v9 = vpop.eup %238 }
  0x19   :  { %v89_v10 = vadd.f32 1.0, %v239_v9  ;;  %v92_v11 = vmul.f32 -0.5, %v239_v9  ;;  %v95_v16 = vand.u32 2147483647, %v239_v9  ;;  %v80_v30 = vor.u32 1.1754944e-38, %v79_v20 }
  0x1a   :  { %vm78_vm4 = vcmp.eq.f32.partialorder %v77_v23, 8.507059e+37 }
  0x1b   :  { %242 = vlog2.f32 %v89_v10  ;;  %v93_v13 = vadd.f32 1.0, %v92_v11  ;;  %vm96_vm2 = vcmp.lt.f32.partialorder %v95_v16, 0.0004427343  ;;  %v120_v11 = vld [vmem:[#allocation3] sm:$0x1] }
  0x1d   :  { %v241_v14 = vpop.eup %240  ;;  %v94_v21 = vmul.f32 %v239_v9, %v93_v13  ;;  %v109_v9 = vld [vmem:[#allocation2] sm:$0x1]  ;;  %v140_v13 = vld [vmem:[#allocation5] sm:$0x1] }
  0x1e   :  { %v69_v19 = vmul.f32 %v241_v14, %v67_v7  ;;  %vm74_vm1 = vweird.f32 %v241_v14 }
  0x1f   :  { %vm75_vm3 = vmor %vm73_vm0, %vm74_vm1 }
  0x20   :  { %v70_v22 = vsub.f32 1.0, %v69_v19 }
  0x21   :  { %v243_v24 = vpop.eup %242 }
  0x22   :  { %v91_v27 = vmul.f32 0.6931472, %v243_v24  ;;  %v71_v28 = vmul.f32 %v241_v14, %v70_v22 }
  0x24   :  { %v97_v32 = vsel %vm96_vm2, %v94_v21, %v91_v27  ;;  %v72_v33 = vadd.f32 %v241_v14, %v71_v28 }
  0x25   :  { %v98_v34 = vadd.f32 %v97_v32, %v84_v25 }
  0x26   :  { %v76_v37 = vsel %vm75_vm3, %v241_v14, %v72_v33 }
  0x27   :  { %v104_v38 = vmul.f32 %v98_v34, %v51_v31  ;;  %v81_v39 = vsel %vm78_vm4, %v80_v30, %v76_v37  ;;  %v99_v40 = vadd.f32 %v98_v34, %v50_v1 }
  0x28   :  { %v100_v41 = vmul.f32 %v81_v39, %v51_v31  ;;  %v102_v42 = vadd.f32 %v81_v39, %v51_v31 }
  0x29   :  { %v105_v43 = vsel %vm343_vm5, %v104_v38, 0.0  ;;  %v107_v44 = vmul.f32 %v106_v35, %v99_v40 }
  0x2a   :  { %v131_v45 = vsel %vm110_vm6, %v105_v43, 0.0  ;;  %v101_v46 = vsel %vm343_vm5, %v100_v41, 0.0  ;;  %v103_v47 = vsel %vm343_vm5, %v102_v42, 0.0 }
  0x2b   :  { %v132_v48 = vrot.slane %v131_v45, 4  ;;  %v111_v49 = vsel %vm110_vm6, %v101_v46, 0.0  ;;  %v108_v50 = vsel %vm343_vm5, %v107_v44, 0.0  ;;  %v121_v51 = vsel %vm110_vm6, %v103_v47, 0.0 }
  0x2c   :  { %v112_v52 = vrot.slane %v111_v49, 4  ;;  %v141_v53 = vsel %vm110_vm6, %v108_v50, 0.0  ;;  %v122_v54 = vrot.slane %v121_v51, 4 }
  0x2d   :  { %v133_v55 = vadd.f32 %v132_v48, %v131_v45  ;;  %v142_v56 = vrot.slane %v141_v53, 4 }
  0x2e   :  { %v113_v57 = vadd.f32 %v112_v52, %v111_v49  ;;  %v123_v58 = vadd.f32 %v122_v54, %v121_v51 }
  0x2f   :  { %v134_v59 = vrot.slane %v133_v55, 2  ;;  %v143_v60 = vadd.f32 %v142_v56, %v141_v53 }
  0x30   :  { %v114_v61 = vrot.slane %v113_v57, 2  ;;  %v124_v62 = vrot.slane %v123_v58, 2 }
  0x31   :  { %v135_v63 = vadd.f32 %v134_v59, %v133_v55  ;;  %v144_v0 = vrot.slane %v143_v60, 2 }
  0x32   :  { %v115_v1 = vadd.f32 %v114_v61, %v113_v57  ;;  %v125_v2 = vadd.f32 %v124_v62, %v123_v58 }
  0x33   :  { %v136_v3 = vrot.slane %v135_v63, 1  ;;  %v145_v4 = vadd.f32 %v144_v0, %v143_v60 }
  0x34   :  { %v116_v6 = vrot.slane %v115_v1, 1  ;;  %v126_v7 = vrot.slane %v125_v2, 1 }
  0x35   :  { %v137_v8 = vadd.f32 %v136_v3, %v135_v63  ;;  %v146_v10 = vrot.slane %v145_v4, 1 }
  0x36   :  { %v117_v12 = vadd.f32 %v116_v6, %v115_v1  ;;  %v127_v14 = vadd.f32 %v126_v7, %v125_v2 }
  0x37   :  { %v138_v15 = vadd.f32 %v137_v8, %v130_v5  ;;  %v147_v16 = vadd.f32 %v146_v10, %v145_v4 }
  0x38   :  { %v118_v17 = vadd.f32 %v117_v12, %v109_v9  ;;  %v128_v18 = vadd.f32 %v127_v14, %v120_v11 }
  0x39   :  { %139 = vst [vmem:[#allocation4] sm:$0x1] %v138_v15  ;;  %v148_v19 = vadd.f32 %v147_v16, %v140_v13 }
  0x3a   :  { %119 = vst [vmem:[#allocation2] sm:$0x1] %v118_v17 }
  0x3b   :  { %149 = vst [vmem:[#allocation5] sm:$0x1] %v148_v19 }
  0x3c   :  { %129 = vst [vmem:[#allocation3] sm:$0x1] %v128_v18 }
  0x40   :  { %v180_v20 = vld [vmem:[#allocation4] sm:$0x1] }
  0x41   :  { %v181_v21 = vsel %vm154_vm7, %v180_v20, 0.0  ;;  %v153_v22 = vld [vmem:[#allocation2] sm:$0x1] }
  0x42   :  { %182 = vadd.xlane.f32.xlu1 %v181_v21  ;;  %v155_v23 = vsel %vm154_vm7, %v153_v22, 0.0  ;;  %v193_v24 = vld [vmem:[#allocation5] sm:$0x1] }
  0x43   :  { %156 = vadd.xlane.f32.xlu0 %v155_v23  ;;  %v167_v25 = vld [vmem:[#allocation3] sm:$0x1]  ;;  %v194_v26 = vsel %vm154_vm7, %v193_v24, 0.0 }
  0x44   :  { %v168_v27 = vsel %vm154_vm7, %v167_v25, 0.0 }
  0x4a   :  { %195 = vadd.xlane.f32.xlu1 %v194_v26 }
  0x4b   :  { %169 = vadd.xlane.f32.xlu0 %v168_v27 }
  0xb5   :  { %v183_v28 = vpop.xlane.xlu1 %182 }
  0xb6   :  { %v184_v29 = vrot.slane %v183_v28, 4  ;;  %v157_v30 = vpop.xlane.xlu0 %156 }
  0xb7   :  { %v158_v31 = vrot.slane %v157_v30, 4 }
  0xb8   :  { %v185_v33 = vadd.f32 %v184_v29, %v183_v28 }
  0xb9   :  { %v159_v32 = vadd.f32 %v158_v31, %v157_v30 }
  0xba   :  { %v186_v37 = vrot.slane %v185_v33, 2 }
  0xbb   :  { %v160_v34 = vrot.slane %v159_v32, 2 }
  0xbc   :  { %v187_v46 = vadd.f32 %v186_v37, %v185_v33 }
  0xbd   :  { %v196_v35 = vpop.xlane.xlu1 %195  ;;  %v161_v36 = vadd.f32 %v160_v34, %v159_v32 }
  0xbe   :  { %v197_v38 = vrot.slane %v196_v35, 4  ;;  %v170_v39 = vpop.xlane.xlu0 %169  ;;  %v188_v50 = vrot.slane %v187_v46, 1 }
  0xbf   :  { %v171_v40 = vrot.slane %v170_v39, 4  ;;  %v162_v41 = vrot.slane %v161_v36, 1 }
  0xc0   :  { %v198_v42 = vadd.f32 %v197_v38, %v196_v35  ;;  %v189_v55 = vadd.f32 %v188_v50, %v187_v46 }
  0xc1   :  { %v172_v43 = vadd.f32 %v171_v40, %v170_v39  ;;  %v163_v44 = vadd.f32 %v162_v41, %v161_v36 }
  0xc2   :  { %v199_v45 = vrot.slane %v198_v42, 2 }
  0xc3   :  { %v173_v47 = vrot.slane %v172_v43, 2  ;;  %224 = vpush %v163_v44 }
  0xc4   :  { %v200_v48 = vadd.f32 %v199_v45, %v198_v42 }
  0xc5   :  { %v174_v49 = vadd.f32 %v173_v47, %v172_v43 }
  0xc6   :  { %v201_v51 = vrot.slane %v200_v48, 1 }
  0xc7   :  { %v175_v52 = vrot.slane %v174_v49, 1 }
  0xc8   :  { %v202_v54 = vadd.f32 %v201_v51, %v200_v48 }
  0xc9   :  { %v176_v53 = vadd.f32 %v175_v52, %v174_v49 }
  0xcb   :  { %226 = vpush %v176_v53 }
  0xcc   :  { %228 = vpush %v189_v55 }
  0xcd   :  { %230 = vpush %v202_v54 }
  0xf4   :  { %s225_s0 = spop %224 }
  0xf5   :  { %166 = sst [smem:[#allocation13]] %s225_s0 }
  0xfc   :  { %s227_s25 = spop %226 }
  0xfd   :  { %179 = sst [smem:[#allocation13 + $0x1]] %s227_s25  ;;  %s229_s26 = spop %228 }
  0xfe   :  { %192 = sst [smem:[#allocation13 + $0x2]] %s229_s26  ;;  %s231_s27 = spop %230 }
  0xff   :  { %205 = sst [smem:[#allocation13 + $0x3]] %s231_s27 }
 0x100   :  { %214 = dma.smem_to_hbm %s313_s28, 16, %s212_s24, [#allocation10]  }
 0x101   :  { %308 = dma.done.wait [#allocation10], 16  }
 0x102   :  { %309 = vsyncadd [#allocation10], 4294967280 }
 0x103   :  { %219 = sfence }
 0x104   :  { %220 = vsyncpa [#allocation9], 1 }
 0x105   :  { %221 = vsyncpa [#allocation12], 1 }
 0x106   :  { %222 = vsyncpa [#allocation10], 1 }

</bundles_post_ra>
